<compile_context>
chip_gen: v7x
topology: tpu7x:2x2x1
jax: 0.10.0
libtpu: 0.0.40
codegen_flags: <defaults>
</compile_context>

<pallas_src>
import functools

import jax
import jax.numpy as jnp
from jax import lax
from jax.experimental import pallas as pl
from jax.experimental.pallas import tpu as pltpu


_TARGET_BLOCK_BYTES = 2 * 1024 * 1024   # ~in+out bytes per grid step
_MIN_PIPELINE_STEPS = 4                 # give the double-buffer pipeline work
_DEFAULT_CHUNK = 512                    # row chunk for the chunked kernel


# ----------------------------------------------------------------------------
# Small helpers
# ----------------------------------------------------------------------------

def _col_reciprocal(s):
    """1/s per column: approx EUP reciprocal + one Newton step (cheap, ~1e-7 rel)."""
    r = pl.reciprocal(s, approx=True)
    return r * (2.0 - s * r)


def _vmem_caps():
    """(tile_budget, vmem_limit) in bytes, derived from this chip's VMEM."""
    try:
        cap = int(pltpu.get_tpu_info().vmem_capacity_bytes)
    except Exception:
        cap = 64 * 1024 * 1024        # conservative default (v7x physical VMEM)
    cap = min(cap, 128 * 1024 * 1024)
    tile_budget = int(cap * 0.50)     # budget for resident blocks + intermediates
    vmem_limit = int(cap * 0.72)      # scoped-VMEM limit (headroom for Mosaic)
    return tile_budget, vmem_limit


def _shape_bd(budget_bd, n_rows, padded_d, itemsize):
    """Pick the lane-block width from budget / byte-target / pipeline-depth."""
    # ~2 MiB of in+out per grid step amortizes the ~0.35 us per-step overhead
    # without producing absurdly wide blocks for small N.
    tgt = (_TARGET_BLOCK_BYTES // max(1, n_rows * 2 * itemsize)) // 128 * 128
    bd = min(budget_bd, max(tgt, 128), padded_d)
    if bd < 128:
        return bd
    # Ensure the auto-pipeline has >= ~4 steps to overlap DMA-in / compute /
    # writeback, but keep blocks lane-dense (>=512 lanes when D allows it).
    if padded_d // bd < _MIN_PIPELINE_STEPS:
        floor_bd = 512 if padded_d >= _MIN_PIPELINE_STEPS * 512 else 128
        cand = max((padded_d // _MIN_PIPELINE_STEPS) // 128 * 128, floor_bd)
        bd = min(bd, cand)
    return bd


# ----------------------------------------------------------------------------
# Kernels
# ----------------------------------------------------------------------------

def _softmax_dim0_kernel(x_ref, o_ref):
    """Single-pass kernel: all N rows of a column slab resident, full f32 e."""
    e = jnp.exp(x_ref[...].astype(jnp.float32))      # (N, bd) f32
    s = jnp.sum(e, axis=0, keepdims=True)            # (1, bd) column sums
    o_ref[...] = (e * _col_reciprocal(s)).astype(o_ref.dtype)


def _softmax_dim0_chunked_kernel(x_ref, o_ref, *, n_rows, chunk):
    """Single-pass kernel that never materializes the full (N, bd) f32 exp.

    Column sums are accumulated over row chunks (fori_loop over sub-slices of
    the resident block); exp is recomputed per chunk when scaling.  EUP work
    doubles but the kernel is memory-bound, and VMEM per lane drops to the
    double-buffered in/out blocks only, so much larger N stays single-pass.
    """
    bd = x_ref.shape[1]
    n_full = n_rows // chunk
    rem = n_rows - n_full * chunk

    def _exp_chunk(start, size):
        return jnp.exp(x_ref[pl.ds(start, size), :].astype(jnp.float32))

    # Pass A: column sums of exp.
    def sum_body(i, acc):
        start = pl.multiple_of(i * chunk, chunk)
        return acc + jnp.sum(_exp_chunk(start, chunk), axis=0, keepdims=True)

    s = jnp.zeros((1, bd), jnp.float32)
    if n_full > 0:
        s = lax.fori_loop(0, n_full, sum_body, s)
    if rem > 0:
        s = s + jnp.sum(_exp_chunk(n_full * chunk, rem), axis=0, keepdims=True)

    inv = _col_reciprocal(s)

    # Pass B: recompute exp per chunk, scale, store.
    def scale_body(i, carry):
        start = pl.multiple_of(i * chunk, chunk)
        o_ref[pl.ds(start, chunk), :] = (
            _exp_chunk(start, chunk) * inv).astype(o_ref.dtype)
        return carry

    if n_full > 0:
        lax.fori_loop(0, n_full, scale_body, 0)
    if rem > 0:
        o_ref[pl.ds(n_full * chunk, rem), :] = (
            _exp_chunk(n_full * chunk, rem) * inv).astype(o_ref.dtype)


def _colsum_exp_kernel(x_ref, s_ref, *, n_rows, bn):
    """Pass 1 of the row-tiled path: accumulate per-column sum(exp(x))."""
    r = pl.program_id(1)  # row-block axis ("arbitrary", last)

    @pl.when(r == 0)
    def _():
        s_ref[...] = jnp.zeros_like(s_ref)

    def _accum(masked):
        e = jnp.exp(x_ref[...].astype(jnp.float32))
        if masked:
            # (bn, 1) iota vs. scalar rows-left; broadcast in the select.
            rows_left = n_rows - r * bn
            row = lax.broadcasted_iota(jnp.int32, (bn, 1), 0)
            e = jnp.where(row < rows_left, e, 0.0)
        s_ref[...] += jnp.sum(e, axis=0, keepdims=True)

    if n_rows % bn == 0:
        _accum(False)                  # bn divides N: never mask
    else:
        last = pl.num_programs(1) - 1

        @pl.when(r != last)
        def _():
            _accum(False)              # interior row blocks: no mask

        @pl.when(r == last)
        def _():
            _accum(True)               # only the ragged last block masks


def _scale_by_inv_sum_kernel(x_ref, s_ref, o_ref):
    """Pass 2 of the row-tiled path: out = exp(x) * (1 / colsum)."""
    e = jnp.exp(x_ref[...].astype(jnp.float32))
    o_ref[...] = (e * _col_reciprocal(s_ref[...])).astype(o_ref.dtype)


# ----------------------------------------------------------------------------
# pallas_call wrappers
# ----------------------------------------------------------------------------

def _softmax_single_pass(x, bd, vmem_limit, chunk=None):
    N, D = x.shape
    grid = (pl.cdiv(D, bd),)
    if chunk is None:
        kernel = _softmax_dim0_kernel
    else:
        kernel = functools.partial(_softmax_dim0_chunked_kernel,
                                   n_rows=N, chunk=chunk)
    return pl.pallas_call(
        kernel,
        out_shape=jax.ShapeDtypeStruct((N, D), x.dtype),
        grid_spec=pltpu.PrefetchScalarGridSpec(
            num_scalar_prefetch=0,
            grid=grid,
            in_specs=[pl.BlockSpec((N, bd), lambda j: (0, j))],
            out_specs=pl.BlockSpec((N, bd), lambda j: (0, j)),
        ),
        # TODO(synk): on v7x, verify both TensorCores stream column stripes
        # (pltpu.CORE_PARALLEL / core_map) — "parallel" relies on megacore
        # sharding of the lane-block axis.
        compiler_params=pltpu.CompilerParams(
            dimension_semantics=("parallel",),
            vmem_limit_bytes=vmem_limit,
        ),
    )(x)


def _softmax_two_pass(x, tile_budget, vmem_limit, bn=None, bd=None):
    """Row-tiled path for N too large to keep a full column slab resident."""
    N, D = x.shape
    itemsize = x.dtype.itemsize
    padded_d = pl.cdiv(D, 128) * 128
    if bd is None:
        bd = min(1024, padded_d)
    if bn is None:
        # double-buffered in/out (bn, bd) blocks + f32 intermediates, per row
        per_row = bd * (4 * itemsize + 16)
        bn = (tile_budget // per_row) // 8 * 8
        # keep each in/out block in the 1-2 MiB range
        bn_bytes_cap = max(8, (2 * 1024 * 1024) // max(1, bd * itemsize) // 8 * 8)
        bn = max(8, min(bn, pl.cdiv(N, 8) * 8, bn_bytes_cap))
    n_col = pl.cdiv(D, bd)
    n_row = pl.cdiv(N, bn)

    # Pass 1: per-column sums of exp(x), accumulated over row blocks.
    sums = pl.pallas_call(
        functools.partial(_colsum_exp_kernel, n_rows=N, bn=bn),
        out_shape=jax.ShapeDtypeStruct((1, D), jnp.float32),
        grid_spec=pltpu.PrefetchScalarGridSpec(
            num_scalar_prefetch=0,
            grid=(n_col, n_row),
            in_specs=[pl.BlockSpec((bn, bd), lambda j, r: (r, j))],
            out_specs=pl.BlockSpec((1, bd), lambda j, r: (0, j)),
        ),
        compiler_params=pltpu.CompilerParams(
            dimension_semantics=("parallel", "arbitrary"),
            vmem_limit_bytes=vmem_limit,
        ),
    )(x)

    # Pass 2: elementwise exp(x) * (1 / colsum).
    return pl.pallas_call(
        _scale_by_inv_sum_kernel,
        out_shape=jax.ShapeDtypeStruct((N, D), x.dtype),
        grid_spec=pltpu.PrefetchScalarGridSpec(
            num_scalar_prefetch=0,
            grid=(n_col, n_row),
            in_specs=[pl.BlockSpec((bn, bd), lambda j, r: (r, j)),
                      pl.BlockSpec((1, bd), lambda j, r: (0, j))],
            out_specs=pl.BlockSpec((bn, bd), lambda j, r: (r, j)),
        ),
        compiler_params=pltpu.CompilerParams(
            dimension_semantics=("parallel", "parallel"),
            vmem_limit_bytes=vmem_limit,
        ),
    )(x, sums)


# ----------------------------------------------------------------------------
# Public wrapper
# ----------------------------------------------------------------------------

def softmax_dim0(x, *, _force_two_pass=False, _force_chunked=False,
                 _bn=None, _bd=None, _chunk=None):
    """exp(x) / exp(x).sum(dim=0) — matches the PyTorch Softmax module."""
    orig_shape = x.shape
    x2d = x if x.ndim == 2 else x.reshape((x.shape[0], -1))
    N, D = x2d.shape

    tile_budget, vmem_limit = _vmem_caps()
    itemsize = x2d.dtype.itemsize
    padded_d = pl.cdiv(D, 128) * 128

    if _force_two_pass:
        out2d = _softmax_two_pass(x2d, tile_budget, vmem_limit, bn=_bn, bd=_bd)
        return out2d.reshape(orig_shape)

    chunk = _DEFAULT_CHUNK if _chunk is None else _chunk
    chunk = max(8, min(chunk, pl.cdiv(N, 8) * 8))

    # VMEM per lane, per mode:
    #   simple : double-buffered in/out blocks + full f32 exp/product intermediate
    #   chunked: double-buffered in/out blocks + (chunk, bd) f32 chunk intermediates
    per_lane_simple = N * (4 * itemsize + 8)
    per_lane_chunked = N * 4 * itemsize + chunk * 8

    budget_bd_simple = (tile_budget // per_lane_simple) // 128 * 128
    budget_bd_chunked = (tile_budget // per_lane_chunked) // 128 * 128

    use_simple = (not _force_chunked) and (
        budget_bd_simple >= min(512, padded_d))

    if use_simple:
        bd = _shape_bd(budget_bd_simple, N, padded_d, itemsize)
        if _bd is not None:
            bd = min(bd, _bd)
        out2d = _softmax_single_pass(x2d, bd, vmem_limit)
    elif budget_bd_chunked >= 128 or _force_chunked:
        bd = _shape_bd(max(budget_bd_chunked, 128), N, padded_d, itemsize)
        if _bd is not None:
            bd = min(bd, _bd)
        out2d = _softmax_single_pass(x2d, bd, vmem_limit, chunk=chunk)
    else:
        # N too large even for a 128-lane full-column block: two-pass row tiling.
        out2d = _softmax_two_pass(x2d, tile_budget, vmem_limit, bn=_bn, bd=_bd)
    return out2d.reshape(orig_shape)


# ----------------------------------------------------------------------------
# Self-test
# ----------------------------------------------------------------------------

if __name__ == "__main__":
    key = jax.random.PRNGKey(0)
    k1, k2, k3, k4, k5 = jax.random.split(key, 5)

    def ref(x):
        e = jnp.exp(x)
        return e / e.sum(axis=0)

    # Primary shape consistent with the module: softmax over dim 0 of a 4-D input.
    x0 = jax.random.normal(k1, (2, 4, 16, 16), dtype=jnp.float32)
    o0 = jax.block_until_ready(softmax_dim0(x0))
    assert o0.shape == x0.shape
    assert jnp.allclose(o0, ref(x0), atol=1e-5, rtol=1e-5)

    # Single-pass, single (ragged, smaller-than-block) lane slab.
    x1 = jax.random.normal(k2, (8, 32), dtype=jnp.float32)
    o1 = jax.block_until_ready(softmax_dim0(x1))
    assert jnp.allclose(o1, ref(x1), atol=1e-5, rtol=1e-5)

    # Single-pass, multi-step lane grid (bd shrinks to 128 -> 3 pipeline steps).
    x2 = jax.random.normal(k3, (16, 384), dtype=jnp.float32)
    o2 = jax.block_until_ready(softmax_dim0(x2))
    assert jnp.allclose(o2, ref(x2), atol=1e-5, rtol=1e-5)

    # Row-chunked single-pass path (used for large N), forced with a tiny chunk
    # so the fori_loop chunks + ragged remainder are exercised.
    x3 = jax.random.normal(k4, (20, 160), dtype=jnp.float32)
    o3 = jax.block_until_ready(softmax_dim0(x3, _force_chunked=True, _chunk=8))
    assert jnp.allclose(o3, ref(x3), atol=1e-5, rtol=1e-5)

    # Row-tiled two-pass fallback (very large N), forced at small tiles so the
    # gated ragged-row masking and column-sum accumulation are exercised.
    x4 = jax.random.normal(k5, (20, 320), dtype=jnp.float32)
    o4 = jax.block_until_ready(
        softmax_dim0(x4, _force_two_pass=True, _bn=8, _bd=128))
    assert jnp.allclose(o4, ref(x4), atol=1e-5, rtol=1e-5)

    print("KERNEL_OK")
</pallas_src>

<mosaic_0001>
module attributes {stable_mosaic.version = 11 : i64} {
  func.func @_softmax_dim0_kernel(%arg0: i32, %arg1: memref<2x256xf32, #tpu.memory_space<vmem>>, %arg2: memref<2x256xf32, #tpu.memory_space<vmem>>) attributes {dimension_semantics = [#tpu.dimension_semantics<parallel>], iteration_bounds = array<i64: 4>, scalar_prefetch = 0 : i64, scratch_operands = 0 : i64, tpu.core_type = #tpu.core_type<tc>, window_params = [{transform_indices = @transform_0, window_bounds = array<i64: 2, 256>}, {transform_indices = @transform_1, window_bounds = array<i64: 2, 256>}]} {
    %c0 = arith.constant 0 : index
    %c0_0 = arith.constant 0 : index
    %0 = vector.load %arg1[%c0, %c0_0] : memref<2x256xf32, #tpu.memory_space<vmem>>, vector<2x256xf32>
    %1 = math.exp %0 : vector<2x256xf32>
    %cst = arith.constant dense<0.000000e+00> : vector<256xf32>
    %2 = vector.multi_reduction <add>, %1, %cst [0] : vector<2x256xf32> to vector<256xf32>
    %3 = vector.shape_cast %2 : vector<256xf32> to vector<1x256xf32>
    %4 = tpu.reciprocal %3 {approx = true} : vector<1x256xf32> -> vector<1x256xf32>
    %5 = arith.mulf %3, %4 : vector<1x256xf32>
    %cst_1 = arith.constant 2.000000e+00 : f32
    %6 = vector.broadcast %cst_1 : f32 to vector<1x256xf32>
    %7 = arith.subf %6, %5 : vector<1x256xf32>
    %8 = arith.mulf %4, %7 : vector<1x256xf32>
    %9 = vector.broadcast %8 : vector<1x256xf32> to vector<2x256xf32>
    %10 = arith.mulf %1, %9 : vector<2x256xf32>
    %c0_2 = arith.constant 0 : index
    %c0_3 = arith.constant 0 : index
    %11 = vector.load %arg2[%c0_2, %c0_3] : memref<2x256xf32, #tpu.memory_space<vmem>>, vector<2x256xf32>
    tpu.vector_store %arg2[%c0_2, %c0_3], %10 {strides = array<i32>} : memref<2x256xf32, #tpu.memory_space<vmem>>, vector<2x256xf32>,
    return
  }
  func.func @transform_0(%arg0: i32) -> (i32, i32) {
    %c0_i32 = arith.constant 0 : i32
    %c0_i32_0 = arith.constant 0 : i32
    return %c0_i32, %arg0 : i32, i32
  }
  func.func @transform_1(%arg0: i32) -> (i32, i32) {
    %c0_i32 = arith.constant 0 : i32
    %c0_i32_0 = arith.constant 0 : i32
    return %c0_i32, %arg0 : i32, i32
  }
}

</mosaic_0001>

<bundles_post_ra>
// kernel: tpu_custom_call.1
= control target key start
LH: loop header
LB: loop body
LE: loop exit
PB: predicated region body
PF: predicated region fallthrough
CT: control target
= control target key end

     0   :  { %6 = vsyncpa [#allocation3], 0  ;;  %s613_s0 = inlined_call_operand.hbm [shape: f32[2,1024], index: 0, kind: input, shape index: {}]   ;;  %s614_s1 = inlined_call_operand.hbm [shape: f32[2,1024], index: 1, kind: output, shape index: {}]  }
   0x1   :  { %8 = vsyncpa [#allocation3 + $0x1], 0 }
   0x2   :  { %9 = vsyncpa [#allocation4], 0 }
   0x3   :  { %11 = vsyncpa [#allocation4 + $0x1], 0  ;;  %s450_s6 = smov 0   ;;  %s452_s7 = smov 0  }
   0x4   :  { %s454_s8 = smov 0   ;;  %s456_s9 = smov 0  }
   0x5 LB: > { %s471_s10 = sadd.s32 4294967295, %s435_s9   ;;  %s270_s11 = sadd.s32 4294967294, %s435_s9   ;;  %s435_s9 = sphi %s456_s9, %s628_s9   ;;  %s431_s8 = sphi %s454_s8, %s627_s8   ;;  %s427_s7 = sphi %s452_s7, %s626_s7   ;;  %s423_s6 = sphi %s450_s6, %s625_s6  }
   0x6   : > { %s475_s12 = sadd.s32 1, %s435_s9   ;;  %s24_s13 = sadd.s32 1, %s431_s8 }
   0x7   : > { %s21_s14 = ssub.s32 %s435_s9, %s475_s12  ;;  %p31_p0 = scmp.ne.s32.totalorder %s431_s8, %s427_s7 }
   0x8   : > { %p22_p1 = scmp.eq.s32.totalorder %s21_s14, 0  ;;  %p32_p2 = scmp.eq.s32.totalorder %s435_s9, 0 }
   0x9   : > { %p37_p3 = scmp.ne.s32.totalorder %s427_s7, %s423_s6  ;;  %p38_p4 = scmp.eq.s32.totalorder %s471_s10, 0 }
   0xa   : > { %s487_s15 = scalar_select %p22_p1, %s431_s8, %s24_s13  }
   0xb   : > { %p489_p5 = por %p32_p2, %p31_p0  ;;  %p493_p6 = por %p38_p4, %p37_p3 }
   0xc   : > { %p61_p7 = scmp.eq.s32.totalorder %s471_s10, 3  ;;  %p67_p8 = scmp.eq.s32.totalorder %s270_s11, 3 }
   0xd   : > { %p298_p9 = scmp.lt.s32.totalorder %s435_s9, 4  ;;  %s87_s20 = sand.u32 1, %s431_s8  }
   0xe   : > { %p499_p10 = por %p61_p7, %p31_p0  ;;  %p503_p11 = por %p67_p8, %p37_p3 }
   0xf   : > { %s284_s21 = sshll.u32 %s435_s9, 6  ;;  %s273_s22 = sshll.u32 %s87_s20, 2 }
  0x10   : > { %s618_s18 = scalar_select %p499_p10, 1, 0 }
  0x11   : > { %s619_s19 = scalar_select %p503_p11, 1, 0 }
  0x12   : > { %s512_s25 = scalar_lea.hbm %s613_s0, %s284_s21  ;;  %s91_s26 = scalar_lea.vmem [#allocation2], %s273_s22 }
  0x13   : > { %s99_s27 = sshll.u32 %s91_s26, 4  ;;  %p516_p12 = pnand %p298_p9, %p489_p5  ;;  %s520_s27 = int_to_ptr.vmem [resolvable:$true] %s99_s27 }
  0x14   : > { %s88_s29 = scalar_lea.sflag [#allocation3], %s87_s20  ;;  %s339_s30 = scalar_lea.hbm %s512_s25, 64 }
  0x15   : > { %p340_p1 = scmp.ne.s32.totalorder %s512_s25, %s339_s30  ;;  %p341_p2 = pneg %p516_p12 }
  0x16   : > { %s344_s4 = scalar_lea.hbm %s613_s0, 256  ;;  %p345_p5 = scmp.lt.u32.totalorder %s512_s25, %s613_s0 }
  0x17   : > { %p342_p3 = pnand %p341_p2, %p340_p1  ;;  %p346_p7 = scmp.lt.u32.totalorder %s344_s4, %s339_s30 }
  0x18   : > { %p348_p9 = scmp.lt.u32.totalorder %s339_s30, %s512_s25 }
  0x19   : > { %p343_p4 = pneg %p342_p3  ;;  %p347_p8 = por %p346_p7, %p345_p5 }
  0x1b   : > { %p349_p13 = por %p348_p9, %p347_p8 }
  0x1d   : > { %p350_p0 = pnand %p349_p13, %p343_p4 }
  0x1f   : > { %353 = shalt.err (!%p350_p0)
}
  0x20   : > { %s354_s13 = scalar_lea.vmem %s520_s27, 64  ;;  %s437_s14 = smov [#allocation2]  }
  0x21   : > { %p355_p1 = scmp.ne.s32.totalorder %s520_s27, %s354_s13  ;;  %s359_s16 = sshll.u32 %s437_s14, 4  ;;  %s360_s16 = int_to_ptr.vmem [resolvable:$false] %s359_s16 }
  0x22   : > { %s361_s20 = scalar_lea.vmem %s360_s16, 128  ;;  %p362_p10 = scmp.lt.s32.totalorder %s520_s27, %s360_s16 }
  0x23   : > { %p357_p3 = pnand %p355_p1, %p341_p2  ;;  %p363_p5 = scmp.lt.s32.totalorder %s361_s20, %s354_s13 }
  0x25   : > { %p358_p11 = pneg %p357_p3  ;;  %p364_p7 = por %p363_p5, %p362_p10 }
  0x27   : > { %p365_p8 = pnand %p364_p7, %p358_p11 }
  0x29   : > { %368 = shalt.err (!%p365_p8)
}
  0x2a   : > { %293 = dma.hbm_to_vmem [thread:$0]  (!%p516_p12), %s512_s25, 64, %s520_s27, %s88_s29  }
  0x2b   : > { %p621_p13 = scmp.lt.s32.totalorder %s435_s9, 5  ;;  %p622_p0 = scmp.ge.s32.totalorder %s435_s9, 1 }
  0x2d   : > { %p105_p2 = pnand %p622_p0, %p621_p13 }
  0x2e   : > { %s554_s21 = sand.u32 (!%p105_p2), 1, %s427_s7  }
  0x2f   : > { %108 = sbr.rel (%p105_p2) target bundleno = 123 (0x7b), region = 24  ;;  %s277_s22 = sshll.u32 (!%p105_p2), %s554_s21, 2 }
  0x30   : > { %s111_s23 = scalar_lea.sflag (!%p105_p2), [#allocation3], %s554_s21  ;;  %s114_s24 = scalar_lea.vmem (!%p105_p2), [#allocation2], %s277_s22 }
  0x36   : > { %414 = dma.done.wait (%p493_p6), %s111_s23, 64  }
  0x37   : > { %416 = vsyncadd (%p493_p6), %s111_s23, 4294967232  ;;  %v135_v0 = vld [vmem:[%s114_s24] sm:$0xf]  ;;  %v438_v2 = vmov 1983009808   ;;  %v142_v4 = vlaneseq  ;;  %vm149_vm0 = vcmask 1041408  }
  0x38   : > { %v136_v1 = vmul.f32 1.442695, %v135_v0  ;;  %v140_v3 = vunpack.c.l.s4 %v438_v2  ;;  %s132_s17 = scalar_lea.vmem [#allocation5], %s277_s22  ;;  %s285_s26 = sshll.u32 %s471_s10, 6 }
  0x39   : > { %v143_v6 = vshrl.u32 %v142_v4, 7  ;;  %s200_s25 = sshll.u32 %s132_s17, 4  ;;  %s572_s29 = scalar_lea.hbm %s614_s1, %s285_s26  ;;  %s567_s25 = int_to_ptr.vmem [resolvable:$true] %s200_s25 }
  0x3a   : > { %333 = vpow2.f32 %v136_v1  ;;  %v141_v5 = vunpack.c.0.s8 %v140_v3  ;;  %s186_s30 = scalar_lea.sflag [#allocation4], %s554_s21  ;;  %s369_s2 = scalar_lea.vmem %s567_s25, 64 }
  0x3b   : > { %p370_p6 = scmp.ne.s32.totalorder %s567_s25, %s369_s2  ;;  %p623_p10 = scmp.ne.s32.totalorder %s618_s18, 0 }
  0x3c   : > { %v144_v7 = vsub.s32 %v141_v5, %v143_v6  ;;  %s439_s10 = smov [#allocation5]  }
  0x3d   : > { %p371_p11 = pnand %p370_p6, %p623_p10  ;;  %s373_s3 = sshll.u32 %s439_s10, 4  ;;  %s374_s3 = int_to_ptr.vmem [resolvable:$false] %s373_s3 }
  0x3e   : > { %s375_s4 = scalar_lea.vmem %s374_s3, 128  ;;  %p376_p4 = scmp.lt.s32.totalorder %s567_s25, %s374_s3 }
  0x3f   : > { %p372_p12 = pneg %p371_p11  ;;  %p377_p9 = scmp.lt.s32.totalorder %s375_s4, %s369_s2 }
  0x41   : > { %p378_p1 = por %p377_p9, %p376_p4 }
  0x43   : > { %p379_p3 = pnand %p378_p1, %p372_p12 }
  0x44   : > { %v334_v8 = vpop.eup %333 }
  0x45   : > { %v145_v9 = vrot.slane %v334_v8, %v144_v7 }
  0x47   : > { %v146_v10 = vcombine.high %v145_v9, %v145_v9  ;;  %v150_v11 = vsel %vm149_vm0, %v145_v9, 0.0 }
  0x48   : > { %v151_v12 = vrot.slane %v150_v11, 4 }
  0x49   : > { %v157_v13 = vsel %vm149_vm0, %v146_v10, 0.0 }
  0x4a   : > { %v152_v14 = vadd.f32 %v151_v12, %v150_v11  ;;  %v158_v15 = vrot.slane %v157_v13, 4 }
  0x4c   : > { %v153_v16 = vrot.slane %v152_v14, 2  ;;  %v159_v17 = vadd.f32 %v158_v15, %v157_v13 }
  0x4e   : > { %v154_v18 = vadd.f32 %v153_v16, %v152_v14  ;;  %v160_v19 = vrot.slane %v159_v17, 2 }
  0x50   : > { %v155_v20 = vrot.slane %v154_v18, 1  ;;  %v161_v21 = vadd.f32 %v160_v19, %v159_v17 }
  0x52   : > { %v156_v22 = vadd.f32 %v155_v20, %v154_v18  ;;  %v162_v23 = vrot.slane %v161_v21, 1 }
  0x54   : > { %v163_v24 = vadd.f32 %v162_v23, %v161_v21  ;;  %335 = vrcp.f32 %v156_v22 }
  0x56   : > { %337 = vrcp.f32 %v163_v24 }
  0x5e   : > { %v336_v25 = vpop.eup %335 }
  0x5f   : > { %v166_v26 = vmul.f32 %v336_v25, %v156_v22 }
  0x60   : > { %v338_v27 = vpop.eup %337 }
  0x61   : > { %v167_v28 = vmul.f32 %v338_v27, %v163_v24  ;;  %v168_v29 = vsub.f32 2.0, %v166_v26 }
  0x63   : > { %v169_v30 = vsub.f32 2.0, %v167_v28  ;;  %v170_v31 = vmul.f32 %v336_v25, %v168_v29 }
  0x65   : > { %v171_v32 = vmul.f32 %v338_v27, %v169_v30 }
  0x67   : > { %v174_v33 = vcombine.low %v170_v31, %v171_v32 }
  0x69   : > { %v181_v34 = vrot.slane %v174_v33, %v144_v7 }
  0x6b   : > { %v183_v35 = vmul.f32 %v334_v8, %v181_v34 }
  0x6d   : > { %184 = vst [vmem:[%s132_s17] sm:$0xf] %v183_v35 }
  0x6e   : > { %382 = shalt.err (!%p379_p3)
}
  0x6f   : > { %s383_s5 = scalar_lea.hbm %s572_s29, 64  ;;  %s387_s14 = scalar_lea.hbm %s614_s1, 256 }
  0x70   : > { %p384_p5 = scmp.ne.s32.totalorder %s572_s29, %s383_s5  ;;  %p388_p13 = scmp.lt.u32.totalorder %s572_s29, %s614_s1 }
  0x71   : > { %p389_p0 = scmp.lt.u32.totalorder %s387_s14, %s383_s5  ;;  %p391_p6 = scmp.lt.u32.totalorder %s383_s5, %s572_s29 }
  0x72   : > { %p385_p7 = pnand %p384_p5, %p623_p10 }
  0x73   : > { %p390_p2 = por %p389_p0, %p388_p13 }
  0x74   : > { %p386_p8 = pneg %p385_p7 }
  0x75   : > { %p392_p11 = por %p391_p6, %p390_p2 }
  0x77   : > { %p393_p12 = pnand %p392_p11, %p386_p8 }
  0x79   : > { %396 = shalt.err (!%p393_p12)
}
  0x7a   : > { %288 = dma.vmem_to_hbm [thread:$0]  (%p623_p10), %s567_s25, 64, %s572_s29, %s186_s30  }
  0x7b PF: > { %p299_p4 = scmp.ge.s32.totalorder %s435_s9, 2  ;;  %s212_s21 = sand.u32 1, %s423_s6  }
  0x7c   : > { %p624_p9 = scmp.ne.s32.totalorder %s619_s19, 0  ;;  %s213_s22 = scalar_lea.sflag [#allocation4], %s212_s21 }
  0x7e   : > { %p295_p1 = pnand %p299_p4, %p624_p9 }
  0x80   : > { %418 = dma.done.wait (!%p295_p1), %s213_s22, 64  }
  0x81   : > { %420 = vsyncadd (!%p295_p1), %s213_s22, 4294967232  ;;  %p14_p3 = scmp.ge.s32.totalorder %s475_s12, 6   ;;  %s625_s6 = smov %s427_s7 }
  0x82   : > { %s626_s7 = smov %s431_s8  ;;  %s627_s8 = smov %s487_s15 }
  0x83   : > { %s628_s9 = smov %s475_s12  ;;  %16 = sbr.rel (!%p14_p3) target bundleno = 5 (0x5), region = 69 }
  0x8a   :  { %218 = vsyncpa [#allocation3], 1 }
  0x8b   :  { %220 = vsyncpa [#allocation3 + $0x1], 1 }
  0x8c   :  { %221 = vsyncpa [#allocation4], 1 }
  0x8d   :  { %223 = vsyncpa [#allocation4 + $0x1], 1 }

</bundles_post_ra>
